<compile_context>
chip_gen: v7x
topology: tpu7x:2x2x1
jax: 0.10.0
libtpu: 0.0.40
codegen_flags: <defaults>
</compile_context>

<pallas_src>
import functools

import jax
import jax.numpy as jnp
from jax.experimental import pallas as pl
from jax.experimental.pallas import tpu as pltpu

LANES = 128          # TPU lane width; padded weight slabs are 128 lanes wide
HID1, HID2 = 32, 16  # hidden sizes fixed by the PyTorch module


def _round_up(n, m):
    return ((n + m - 1) // m) * m


def _dueling_kernel(x_ref, w1_ref, w23_ref, b_ref, o_ref):
    """One grid step = one batch row tile.  Writes lane-dense head activations:
    lane 0 = relu(state_value), lanes [1, 1+A) = relu(advantage), rest = 0."""
    x = x_ref[...]                                     # (TB, D_pad) bf16
    b_all = b_ref[...]                                 # (3, 128) f32

    # dense1: (TB, D_pad) @ (D_pad, 128); lanes >= 32 of the slab are zero.
    h1 = jnp.dot(x, w1_ref[...], preferred_element_type=jnp.float32)
    h1 = jnp.maximum(h1 + b_all[0:1, :], 0.0)          # (TB, 128) f32

    # dense2: padded lanes of h1 and padded rows of the slab are exactly zero,
    # so the full 128-deep matmul is exact (single MXU pass).
    h2 = jnp.dot(h1.astype(jnp.bfloat16), w23_ref[0],
                 preferred_element_type=jnp.float32)
    h2 = jnp.maximum(h2 + b_all[1:2, :], 0.0)          # (TB, 128) f32

    # fused heads: lane 0 = state_value, lanes [1, 1+A) = advantage.
    hv = jnp.dot(h2.astype(jnp.bfloat16), w23_ref[1],
                 preferred_element_type=jnp.float32)
    hv = jnp.maximum(hv + b_all[2:3, :], 0.0)          # (TB, 128) f32

    o_ref[...] = hv.astype(o_ref.dtype)                # lane-dense, unmasked store


def dueling_dqn_forward(x, w1_packed, w23_packed, b_packed, *, action_dim,
                        block_rows=1024, out_dtype=jnp.float32):
    """x: (B, input_dim) float32. Returns (B, action_dim) float32 Q-values.

    out_dtype=jnp.bfloat16 halves the dominant output HBM stream (recommended
    on v5e) at a small precision cost; default f32 matches the reference.
    """
    B, input_dim = x.shape
    d_pad = w1_packed.shape[0]                         # round_up(input_dim, 16)

    # Row tile: multiple of 16 (bf16 sublane packing), capped at block_rows.
    tb = min(_round_up(block_rows, 16), _round_up(max(B, 1), 16))
    b_pad = _round_up(B, tb)
    n_tiles = b_pad // tb

    # Zero-pad rows (batch) and cols (input_dim -> d_pad); pad rows only ever
    # reach the output slab, which is sliced to [:B] before the mean.
    xb = jnp.zeros((b_pad, d_pad), jnp.bfloat16).at[:B, :input_dim].set(
        x.astype(jnp.bfloat16))

    out_itemsize = jnp.dtype(out_dtype).itemsize
    cost = pl.CostEstimate(
        flops=2 * b_pad * (d_pad * LANES + 2 * LANES * LANES),
        transcendentals=0,
        bytes_accessed=(xb.size * 2 + w1_packed.size * 2 + w23_packed.size * 2
                        + b_packed.size * 4 + b_pad * LANES * out_itemsize))

    hv_full = pl.pallas_call(
        _dueling_kernel,
        out_shape=jax.ShapeDtypeStruct((b_pad, LANES), out_dtype),
        grid_spec=pltpu.PrefetchScalarGridSpec(
            num_scalar_prefetch=0,
            grid=(n_tiles,),                           # one axis: batch tiles
            in_specs=[
                # streamed activations: one row tile per grid step (pipelined)
                pl.BlockSpec((tb, d_pad), lambda i: (i, 0)),
                # packed weights / biases: constant index map -> VMEM-resident
                pl.BlockSpec((d_pad, LANES), lambda i: (0, 0)),
                pl.BlockSpec((2, LANES, LANES), lambda i: (0, 0, 0)),
                pl.BlockSpec((3, LANES), lambda i: (0, 0)),
            ],
            out_specs=pl.BlockSpec((tb, LANES), lambda i: (i, 0)),
        ),
        compiler_params=pltpu.CompilerParams(
            # No cross-tile dependency anymore -> batch tiles can be sharded
            # across TensorCores (v7x megacore); no-op on v5e/v6e.
            dimension_semantics=("parallel",)),
        cost_estimate=cost,
    )(xb, w1_packed, w23_packed, b_packed)

    # Wrapper-side finalize (fuses with the slice copy):
    #   q = state_value + advantage - mean(advantage)   [GLOBAL mean, as in torch]
    hv = hv_full[:B].astype(jnp.float32)
    v = hv[:, 0:1]
    adv = hv[:, 1:1 + action_dim]
    return v + adv - jnp.mean(adv)


def init_params(key, input_dim, action_dim):
    """torch.nn.Linear-style init; weights stored [in, out] so y = x @ W + b."""
    def linear(k, fan_in, fan_out):
        kw, kb = jax.random.split(k)
        bound = 1.0 / jnp.sqrt(jnp.float32(fan_in))
        w = jax.random.uniform(kw, (fan_in, fan_out), jnp.float32, -bound, bound)
        b = jax.random.uniform(kb, (1, fan_out), jnp.float32, -bound, bound)
        return w, b

    k1, k2, k3, k4 = jax.random.split(key, 4)
    w1, b1 = linear(k1, input_dim, HID1)
    w2, b2 = linear(k2, HID1, HID2)
    wv, bv = linear(k3, HID2, 1)
    wa, ba = linear(k4, HID2, action_dim)
    return dict(w1=w1, b1=b1, w2=w2, b2=b2, wv=wv, bv=bv, wa=wa, ba=ba)


def pack_params(p, input_dim, action_dim):
    """Pack weights into aligned bf16 slabs + one f32 bias slab.

    w1 slab : (round_up(D,16), 128)  rows [0, D),   lanes [0, 32)
    w23 slab: (2, 128, 128)
       [0] dense2          rows [0, 32),  lanes [0, 16)
       [1] fused heads     rows [0, 16);  lane 0 = state_value,
                                          lanes [1, 1+A) = advantage
    bias slab: (3, 128) f32, one row per layer, zero-padded lanes.
    """
    assert input_dim <= LANES and action_dim <= LANES - 1
    d_pad = _round_up(input_dim, 16)

    w1 = jnp.zeros((d_pad, LANES), jnp.float32)
    w1 = w1.at[:input_dim, :HID1].set(p["w1"])

    w23 = jnp.zeros((2, LANES, LANES), jnp.float32)
    w23 = w23.at[0, :HID1, :HID2].set(p["w2"])
    w23 = w23.at[1, :HID2, 0:1].set(p["wv"])
    w23 = w23.at[1, :HID2, 1:1 + action_dim].set(p["wa"])

    b = jnp.zeros((3, LANES), jnp.float32)
    b = b.at[0, :HID1].set(p["b1"][0])
    b = b.at[1, :HID2].set(p["b2"][0])
    b = b.at[2, 0].set(p["bv"][0, 0])
    b = b.at[2, 1:1 + action_dim].set(p["ba"][0])
    return w1.astype(jnp.bfloat16), w23.astype(jnp.bfloat16), b


def reference_forward(x, p):
    """Pure-JAX reference matching the module semantics (bf16 operands, f32 accum)."""
    def mm(a, w):
        return jnp.dot(a.astype(jnp.bfloat16), w.astype(jnp.bfloat16),
                       preferred_element_type=jnp.float32)
    h1 = jnp.maximum(mm(x, p["w1"]) + p["b1"], 0.0)
    h2 = jnp.maximum(mm(h1, p["w2"]) + p["b2"], 0.0)
    v = jnp.maximum(mm(h2, p["wv"]) + p["bv"], 0.0)
    a = jnp.maximum(mm(h2, p["wa"]) + p["ba"], 0.0)
    a = a - jnp.mean(a)          # GLOBAL mean over all elements, as in PyTorch
    return v + a


if __name__ == "__main__":
    # Small shapes consistent with the module: batch=8, input_dim=16, action_dim=8.
    batch, input_dim, action_dim = 8, 16, 8

    key = jax.random.PRNGKey(0)
    k_params, k_x = jax.random.split(key)
    params = init_params(k_params, input_dim, action_dim)
    x = jax.random.normal(k_x, (batch, input_dim), dtype=jnp.float32)

    w1_packed, w23_packed, b_packed = pack_params(params, input_dim, action_dim)
    q = dueling_dqn_forward(x, w1_packed, w23_packed, b_packed,
                            action_dim=action_dim)
    q = jax.block_until_ready(q)

    q_ref = reference_forward(x, params)
    assert q.shape == (batch, action_dim)
    max_err = float(jnp.max(jnp.abs(q - q_ref)))
    assert jnp.allclose(q, q_ref, atol=1e-2, rtol=1e-2), \
        f"mismatch vs reference (max abs err {max_err:.3e})"

    print("KERNEL_OK")
</pallas_src>

<mosaic_0001>
module attributes {stable_mosaic.version = 11 : i64} {
  func.func @_dueling_kernel(%arg0: i32, %arg1: memref<16x16xbf16, #tpu.memory_space<vmem>>, %arg2: memref<16x128xbf16, #tpu.memory_space<vmem>>, %arg3: memref<2x128x128xbf16, #tpu.memory_space<vmem>>, %arg4: memref<3x128xf32, #tpu.memory_space<vmem>>, %arg5: memref<16x128xf32, #tpu.memory_space<vmem>>) attributes {dimension_semantics = [#tpu.dimension_semantics<parallel>], iteration_bounds = array<i64: 1>, scalar_prefetch = 0 : i64, scratch_operands = 0 : i64, tpu.core_type = #tpu.core_type<tc>, window_params = [{transform_indices = @transform_0, window_bounds = array<i64: 16, 16>}, {pipeline_mode = #tpu.pipeline_mode<synchronous>, transform_indices = @transform_1, window_bounds = array<i64: 16, 128>}, {pipeline_mode = #tpu.pipeline_mode<synchronous>, transform_indices = @transform_2, window_bounds = array<i64: 2, 128, 128>}, {pipeline_mode = #tpu.pipeline_mode<synchronous>, transform_indices = @transform_3, window_bounds = array<i64: 3, 128>}, {transform_indices = @transform_4, window_bounds = array<i64: 16, 128>}]} {
    %c0 = arith.constant 0 : index
    %c0_0 = arith.constant 0 : index
    %0 = vector.load %arg1[%c0, %c0_0] : memref<16x16xbf16, #tpu.memory_space<vmem>>, vector<16x16xbf16>
    %c0_1 = arith.constant 0 : index
    %c0_2 = arith.constant 0 : index
    %1 = vector.load %arg4[%c0_1, %c0_2] : memref<3x128xf32, #tpu.memory_space<vmem>>, vector<3x128xf32>
    %c0_3 = arith.constant 0 : index
    %c0_4 = arith.constant 0 : index
    %2 = vector.load %arg2[%c0_3, %c0_4] : memref<16x128xbf16, #tpu.memory_space<vmem>>, vector<16x128xbf16>
    %cst = arith.constant dense<0.000000e+00> : vector<16x128xf32>
    %3 = tpu.matmul %0, %2, %cst {dimension_numbers = #tpu.dot_dimension_numbers<[1], [0], [0], [1], [0, 0, 1, 1], [], []>} : vector<16x16xbf16>, vector<16x128xbf16>, vector<16x128xf32> -> vector<16x128xf32>
    %4 = vector.extract_strided_slice %1 {offsets = [0, 0], sizes = [1, 128], strides = [1, 1]} : vector<3x128xf32> to vector<1x128xf32>
    %5 = vector.broadcast %4 : vector<1x128xf32> to vector<16x128xf32>
    %6 = arith.addf %3, %5 : vector<16x128xf32>
    %cst_5 = arith.constant 0.000000e+00 : f32
    %7 = vector.broadcast %cst_5 : f32 to vector<16x128xf32>
    %8 = arith.maximumf %6, %7 : vector<16x128xf32>
    %9 = arith.truncf %8 : vector<16x128xf32> to vector<16x128xbf16>
    %c0_6 = arith.constant 0 : index
    %c0_7 = arith.constant 0 : index
    %c0_8 = arith.constant 0 : index
    %10 = vector.load %arg3[%c0_6, %c0_7, %c0_8] : memref<2x128x128xbf16, #tpu.memory_space<vmem>>, vector<1x128x128xbf16>
    %11 = vector.shape_cast %10 : vector<1x128x128xbf16> to vector<128x128xbf16>
    %cst_9 = arith.constant dense<0.000000e+00> : vector<16x128xf32>
    %12 = tpu.matmul %9, %11, %cst_9 {dimension_numbers = #tpu.dot_dimension_numbers<[1], [0], [0], [1], [0, 0, 1, 1], [], []>} : vector<16x128xbf16>, vector<128x128xbf16>, vector<16x128xf32> -> vector<16x128xf32>
    %13 = vector.extract_strided_slice %1 {offsets = [1, 0], sizes = [1, 128], strides = [1, 1]} : vector<3x128xf32> to vector<1x128xf32>
    %14 = vector.broadcast %13 : vector<1x128xf32> to vector<16x128xf32>
    %15 = arith.addf %12, %14 : vector<16x128xf32>
    %cst_10 = arith.constant 0.000000e+00 : f32
    %16 = vector.broadcast %cst_10 : f32 to vector<16x128xf32>
    %17 = arith.maximumf %15, %16 : vector<16x128xf32>
    %18 = arith.truncf %17 : vector<16x128xf32> to vector<16x128xbf16>
    %c1 = arith.constant 1 : index
    %c0_11 = arith.constant 0 : index
    %c0_12 = arith.constant 0 : index
    %19 = vector.load %arg3[%c1, %c0_11, %c0_12] : memref<2x128x128xbf16, #tpu.memory_space<vmem>>, vector<1x128x128xbf16>
    %20 = vector.shape_cast %19 : vector<1x128x128xbf16> to vector<128x128xbf16>
    %cst_13 = arith.constant dense<0.000000e+00> : vector<16x128xf32>
    %21 = tpu.matmul %18, %20, %cst_13 {dimension_numbers = #tpu.dot_dimension_numbers<[1], [0], [0], [1], [0, 0, 1, 1], [], []>} : vector<16x128xbf16>, vector<128x128xbf16>, vector<16x128xf32> -> vector<16x128xf32>
    %22 = vector.extract_strided_slice %1 {offsets = [2, 0], sizes = [1, 128], strides = [1, 1]} : vector<3x128xf32> to vector<1x128xf32>
    %23 = vector.broadcast %22 : vector<1x128xf32> to vector<16x128xf32>
    %24 = arith.addf %21, %23 : vector<16x128xf32>
    %cst_14 = arith.constant 0.000000e+00 : f32
    %25 = vector.broadcast %cst_14 : f32 to vector<16x128xf32>
    %26 = arith.maximumf %24, %25 : vector<16x128xf32>
    %c0_15 = arith.constant 0 : index
    %c0_16 = arith.constant 0 : index
    %27 = vector.load %arg5[%c0_15, %c0_16] : memref<16x128xf32, #tpu.memory_space<vmem>>, vector<16x128xf32>
    tpu.vector_store %arg5[%c0_15, %c0_16], %26 {strides = array<i32>} : memref<16x128xf32, #tpu.memory_space<vmem>>, vector<16x128xf32>,
    return
  }
  func.func @transform_0(%arg0: i32) -> (i32, i32) {
    %c0_i32 = arith.constant 0 : i32
    %c0_i32_0 = arith.constant 0 : i32
    return %arg0, %c0_i32 : i32, i32
  }
  func.func @transform_1(%arg0: i32) -> (i32, i32) {
    %c0_i32 = arith.constant 0 : i32
    %c0_i32_0 = arith.constant 0 : i32
    %c0_i32_1 = arith.constant 0 : i32
    return %c0_i32, %c0_i32_0 : i32, i32
  }
  func.func @transform_2(%arg0: i32) -> (i32, i32, i32) {
    %c0_i32 = arith.constant 0 : i32
    %c0_i32_0 = arith.constant 0 : i32
    %c0_i32_1 = arith.constant 0 : i32
    %c0_i32_2 = arith.constant 0 : i32
    return %c0_i32, %c0_i32_0, %c0_i32_1 : i32, i32, i32
  }
  func.func @transform_3(%arg0: i32) -> (i32, i32) {
    %c0_i32 = arith.constant 0 : i32
    %c0_i32_0 = arith.constant 0 : i32
    %c0_i32_1 = arith.constant 0 : i32
    return %c0_i32, %c0_i32_0 : i32, i32
  }
  func.func @transform_4(%arg0: i32) -> (i32, i32) {
    %c0_i32 = arith.constant 0 : i32
    %c0_i32_0 = arith.constant 0 : i32
    return %arg0, %c0_i32 : i32, i32
  }
}

</mosaic_0001>

<bundles_post_ra>
// kernel: tpu_custom_call.1
= control target key start
LH: loop header
LB: loop body
LE: loop exit
PB: predicated region body
PF: predicated region fallthrough
CT: control target
= control target key end

     0   :  { %9 = vsyncpa [#allocation3], 0  ;;  %s701_s0 = inlined_call_operand.hbm [shape: bf16[16,16], index: 0, kind: input, shape index: {}]   ;;  %s702_s1 = inlined_call_operand.hbm [shape: bf16[16,128], index: 1, kind: input, shape index: {}]   ;;  %s703_s2 = inlined_call_operand.hbm [shape: bf16[2,128,128], index: 2, kind: input, shape index: {}]   ;;  %s704_s3 = inlined_call_operand.vmem [shape: f32[3,128], index: 3, kind: input, shape index: {}]   ;;  %s705_s4 = inlined_call_operand.hbm [shape: f32[16,128], index: 4, kind: output, shape index: {}]  }
   0x1   :  { %10 = vsyncpa [#allocation6], 0 }
   0x2   :  { %11 = vsyncpa [#allocation4], 0  ;;  %s579_s15 = smov [#allocation5]   ;;  %s580_s17 = smov [#allocation2]  }
   0x3   :  { %s29_s16 = sshll.u32 %s579_s15, 4  ;;  %s17_s18 = sshll.u32 %s580_s17, 4  ;;  %s30_s16 = int_to_ptr.vmem [resolvable:$true] %s29_s16  ;;  %s614_s18 = int_to_ptr.vmem [resolvable:$true] %s17_s18 }
   0x4   :  { %s485_s21 = scalar_lea.hbm %s702_s1, 128 }
   0x5   :  { %p486_p0 = scmp.ne.s32.totalorder %s702_s1, %s485_s21  ;;  %p489_p1 = scmp.lt.u32.totalorder %s485_s21, %s702_s1 }
   0x7   :  { %p491_p2 = pnand %p489_p1, %p486_p0 }
   0x9   :  { %494 = shalt.err (!%p491_p2)
}
   0xa   :  { %s495_s26 = scalar_lea.vmem %s30_s16, 128  ;;  %p500_p4 = scmp.lt.s32.totalorder %s30_s16, %s30_s16 }
   0xb   :  { %p496_p3 = scmp.ne.s32.totalorder %s30_s16, %s495_s26  ;;  %p501_p5 = scmp.lt.s32.totalorder %s495_s26, %s495_s26 }
   0xd   :  { %p502_p6 = por %p501_p5, %p500_p4 }
   0xf   :  { %p503_p7 = pnand %p502_p6, %p496_p3 }
  0x11   :  { %506 = shalt.err (!%p503_p7)
}
  0x12   :  { %s581_s27 = smov 64   ;;  %s582_s28 = smov 4  }
  0x13   :  { %35 = dma.hbm_to_vmem [thread:$0]  %s702_s1, 128, %s30_s16, [#allocation6], %s581_s27, %s581_s27, %s582_s28  }
  0x14   :  { %s507_s7 = scalar_lea.hbm %s701_s0, 128 }
  0x15   :  { %p508_p8 = scmp.ne.s32.totalorder %s701_s0, %s507_s7  ;;  %p511_p9 = scmp.lt.u32.totalorder %s507_s7, %s701_s0 }
  0x17   :  { %p513_p10 = pnand %p511_p9, %p508_p8 }
  0x19   :  { %516 = shalt.err (!%p513_p10)
}
  0x1a   :  { %s517_s12 = scalar_lea.vmem %s614_s18, 128  ;;  %p522_p12 = scmp.lt.s32.totalorder %s614_s18, %s614_s18 }
  0x1b   :  { %p518_p11 = scmp.ne.s32.totalorder %s614_s18, %s517_s12  ;;  %p523_p13 = scmp.lt.s32.totalorder %s517_s12, %s517_s12 }
  0x1d   :  { %p524_p0 = por %p523_p13, %p522_p12 }
  0x1f   :  { %p525_p1 = pnand %p524_p0, %p518_p11 }
  0x21   :  { %528 = shalt.err (!%p525_p1)
}
  0x22   :  { %23 = dma.hbm_to_vmem [thread:$0]  %s701_s0, 128, %s614_s18, [#allocation3], %s581_s27, %s581_s27, %s582_s28  }
  0x23   :  { %s583_s14 = smov [#allocation7]   ;;  %s529_s19 = scalar_lea.hbm %s703_s2, 2048 }
  0x24   :  { %s41_s15 = sshll.u32 %s583_s14, 4  ;;  %p530_p2 = scmp.ne.s32.totalorder %s703_s2, %s529_s19  ;;  %s42_s15 = int_to_ptr.vmem [resolvable:$true] %s41_s15 }
  0x25   :  { %p533_p3 = scmp.lt.u32.totalorder %s529_s19, %s703_s2 }
  0x27   :  { %p535_p4 = pnand %p533_p3, %p530_p2 }
  0x29   :  { %538 = shalt.err (!%p535_p4)
}
  0x2a   :  { %s539_s24 = scalar_lea.vmem %s42_s15, 2048  ;;  %p544_p6 = scmp.lt.s32.totalorder %s42_s15, %s42_s15 }
  0x2b   :  { %p540_p5 = scmp.ne.s32.totalorder %s42_s15, %s539_s24  ;;  %p545_p7 = scmp.lt.s32.totalorder %s539_s24, %s539_s24 }
  0x2d   :  { %p546_p8 = por %p545_p7, %p544_p6 }
  0x2f   :  { %p547_p9 = pnand %p546_p8, %p540_p5 }
  0x31   :  { %550 = shalt.err (!%p547_p9)
}
  0x32   :  { %47 = dma.hbm_to_vmem [thread:$0]  %s703_s2, 2048, %s42_s15, [#allocation6], %s581_s27, %s581_s27, %s582_s28  }
  0x33   :  { %573 = dma.done.wait [#allocation3], 128  }
  0x34   :  { %574 = vsyncadd [#allocation3], 4294967168 }
  0x35   :  { %575 = dma.done.wait [#allocation6], 2176  }
  0x36   :  { %576 = vsyncadd [#allocation6], 4294965120  ;;  %v584_v0 = vmov 0.0   ;;  %vm585_vm0 = vmmov 0   ;;  %v467_v1 = vld [vmem:[#allocation5] sm:$0xff]   ;;  %v468_v2 = vld [vmem:[#allocation2] sm:$0xff]   ;;  %v65_v17 = vlaneseq }
  0x37   :  { %411 = vmatprep.subr.bf16.mxu0 %v584_v0  ;;  %413 = vmatprep.mubr.msk.bf16.mxu0 %vm585_vm0, %v584_v0  ;;  %vm80_vm1 = vcmask 130048   ;;  %v469_v3 = vld [vmem:[#allocation7] sm:$0xff]   ;;  %v470_v4 = vld [vmem:[#allocation7 + $0x8] sm:$0xff]   ;;  %v471_v5 = vld [vmem:[#allocation7 + $0x10] sm:$0xff]  }
  0x38   :  { %417 = vmatprep.subr.bf16.mxu1 %v584_v0  ;;  %433 = vmatprep.mubr.msk.bf16.mxu1 %vm585_vm0, %v584_v0  ;;  %v472_v6 = vld [vmem:[#allocation7 + $0x18] sm:$0xff]   ;;  %v473_v7 = vld [vmem:[#allocation7 + $0x20] sm:$0xff]   ;;  %v474_v8 = vld [vmem:[#allocation7 + $0x28] sm:$0xff]   ;;  %v66_v18 = vshrl.u32 %v65_v17, 7 }
  0x39   :  { %412 = vmatpush3.bf16.msra.mxu0 %v467_v1  ;;  %418 = vmatpush3.bf16.msra.mxu1 %v469_v3  ;;  %v475_v9 = vld [vmem:[#allocation7 + $0x30] sm:$0xff]   ;;  %v476_v10 = vld [vmem:[#allocation7 + $0x38] sm:$0xff]   ;;  %v477_v11 = vld [vmem:[#allocation7 + $0x40] sm:$0xff]  }
  0x3a   :  { %437 = vmatprep.subr.bf16.mxu0 %v584_v0  ;;  %419 = vmatprep.subr.bf16.mxu1 %v584_v0  ;;  %v478_v12 = vld [vmem:[#allocation7 + $0x48] sm:$0xff]   ;;  %v479_v13 = vld [vmem:[#allocation7 + $0x50] sm:$0xff]   ;;  %v480_v14 = vld [vmem:[#allocation7 + $0x58] sm:$0xff]   ;;  %v67_v19 = vsub.s32 0, %v66_v18  ;;  %v146_v33 = vsub.s32 1, %v66_v18  ;;  %v259_v44 = vsub.s32 2, %v66_v18 }
  0x3b   :  { %v481_v15 = vld [vmem:[#allocation7 + $0x60] sm:$0xff]   ;;  %v482_v16 = vld [vmem:[#allocation7 + $0x68] sm:$0xff]   ;;  %v62_v20 = vld [vmem:[%s704_s3] sm:$0x7]  ;;  %s586_s3 = smov [#allocation8]  }
  0x3c   :  { %414 = vmatmul.mubr.msk.bf16.vlgmr.msra.gmra.mrb[0].mxu0 %vm80_vm1, %v468_v2  ;;  %v68_v21 = vrot.slane %v62_v20, %v67_v19  ;;  %v483_v31 = vld [vmem:[#allocation7 + $0x70] sm:$0xff]   ;;  %v484_v32 = vld [vmem:[#allocation7 + $0x78] sm:$0xff]   ;;  %v147_v34 = vrot.slane %v62_v20, %v146_v33  ;;  %v260_v45 = vrot.slane %v62_v20, %v259_v44  ;;  %s359_s26 = sshll.u32 %s586_s3, 4  ;;  %s360_s26 = int_to_ptr.vmem [resolvable:$true] %s359_s26 }
  0x3d   :  { %453 = vmatprep.mubr.msk.bf16.mxu0 %vm585_vm0, %v584_v0  ;;  %420 = vmatpush3.bf16.msra.mxu1 %v470_v4  ;;  %s551_s27 = scalar_lea.vmem %s360_s26, 256  ;;  %p556_p11 = scmp.lt.s32.totalorder %s360_s26, %s360_s26 }
  0x3e   :  { %421 = vmatprep.subr.bf16.mxu1 %v584_v0  ;;  %438 = vmatpush3.bf16.msra.mxu0 %v477_v11  ;;  %p552_p10 = scmp.ne.s32.totalorder %s360_s26, %s551_s27  ;;  %p557_p12 = scmp.lt.s32.totalorder %s551_s27, %s551_s27 }
  0x3f   :  { %439 = vmatprep.subr.bf16.mxu0 %v584_v0 }
  0x40   :  { %p558_p13 = por %p557_p12, %p556_p11 }
  0x41   :  { %422 = vmatpush3.bf16.msra.mxu1 %v471_v5 }
  0x42   :  { %423 = vmatprep.subr.bf16.mxu1 %v584_v0  ;;  %440 = vmatpush3.bf16.msra.mxu0 %v478_v12  ;;  %p559_p0 = pnand %p558_p13, %p552_p10 }
  0x43   :  { %441 = vmatprep.subr.bf16.mxu0 %v584_v0 }
  0x45   :  { %424 = vmatpush3.bf16.msra.mxu1 %v472_v6 }
  0x46   :  { %425 = vmatprep.subr.bf16.mxu1 %v584_v0  ;;  %442 = vmatpush3.bf16.msra.mxu0 %v479_v13 }
  0x47   :  { %443 = vmatprep.subr.bf16.mxu0 %v584_v0 }
  0x49   :  { %426 = vmatpush3.bf16.msra.mxu1 %v473_v7 }
  0x4a   :  { %427 = vmatprep.subr.bf16.mxu1 %v584_v0  ;;  %444 = vmatpush3.bf16.msra.mxu0 %v480_v14 }
  0x4b   :  { %445 = vmatprep.subr.bf16.mxu0 %v584_v0 }
  0x4d   :  { %428 = vmatpush3.bf16.msra.mxu1 %v474_v8 }
  0x4e   :  { %429 = vmatprep.subr.bf16.mxu1 %v584_v0  ;;  %446 = vmatpush3.bf16.msra.mxu0 %v481_v15 }
  0x4f   :  { %447 = vmatprep.subr.bf16.mxu0 %v584_v0 }
  0x51   :  { %430 = vmatpush3.bf16.msra.mxu1 %v475_v9 }
  0x52   :  { %431 = vmatprep.subr.bf16.mxu1 %v584_v0  ;;  %448 = vmatpush3.bf16.msra.mxu0 %v482_v16 }
  0x53   :  { %449 = vmatprep.subr.bf16.mxu0 %v584_v0 }
  0x55   :  { %432 = vmatpush3.bf16.msra.mxu1 %v476_v10 }
  0x56   :  { %450 = vmatpush3.bf16.msra.mxu0 %v483_v31 }
  0x57   :  { %451 = vmatprep.subr.bf16.mxu0 %v584_v0 }
  0x5a   :  { %452 = vmatpush3.bf16.msra.mxu0 %v484_v32 }
 0x10f   :  { %v118_v22 = vpop.f32.mrb[0].mxu0 }
 0x110   :  { %v119_v23 = vadd.f32 %v118_v22, %v68_v21  ;;  %v415_v24 = vpop.f32.mrb[1].mxu0 }
 0x111   :  { %v121_v25 = vpop.f32.mrb[2].mxu0 }
 0x112   :  { %v122_v26 = vadd.f32 %v121_v25, %v68_v21  ;;  %v416_v27 = vpop.f32.mrb[3].mxu0  ;;  %v125_v28 = vmax.f32 %v119_v23, 0.0 }
 0x114   :  { %v126_v29 = vmax.f32 %v122_v26, 0.0 }
 0x116   :  { %v127_v30 = vpack.c.bf16 %v126_v29, %v125_v28 }
 0x118   :  { %434 = vmatmul.mubr.bf16.vlgmr.msra.gmra.mrb[0].mxu1 %v127_v30 }
 0x1eb   :  { %v230_v35 = vpop.f32.mrb[0].mxu1 }
 0x1ec   :  { %v231_v36 = vadd.f32 %v230_v35, %v147_v34  ;;  %v435_v37 = vpop.f32.mrb[1].mxu1 }
 0x1ed   :  { %v233_v38 = vpop.f32.mrb[2].mxu1 }
 0x1ee   :  { %v234_v39 = vadd.f32 %v233_v38, %v147_v34  ;;  %v436_v40 = vpop.f32.mrb[3].mxu1  ;;  %v237_v41 = vmax.f32 %v231_v36, 0.0 }
 0x1f0   :  { %v238_v42 = vmax.f32 %v234_v39, 0.0 }
 0x1f2   :  { %v239_v43 = vpack.c.bf16 %v238_v42, %v237_v41 }
 0x1f4   :  { %454 = vmatmul.mubr.bf16.vlgmr.msra.gmra.mrb[4].mxu0 %v239_v43 }
 0x2c7   :  { %v343_v46 = vpop.f32.mrb[4].mxu0 }
 0x2c8   :  { %v344_v47 = vadd.f32 %v343_v46, %v260_v45  ;;  %v455_v48 = vpop.f32.mrb[5].mxu0 }
 0x2c9   :  { %v346_v49 = vpop.f32.mrb[6].mxu0 }
 0x2ca   :  { %v350_v50 = vmax.f32 %v344_v47, 0.0  ;;  %v347_v51 = vadd.f32 %v346_v49, %v260_v45  ;;  %v456_v52 = vpop.f32.mrb[7].mxu0 }
 0x2cc   :  { %352 = vst [vmem:[#allocation8] sm:$0xff] %v350_v50  ;;  %v351_v53 = vmax.f32 %v347_v51, 0.0 }
 0x2ce   :  { %353 = vst [vmem:[#allocation8 + $0x8] sm:$0xff] %v351_v53 }
 0x2cf   :  { %562 = shalt.err (!%p559_p0)
}
 0x2d0   :  { %s563_s30 = scalar_lea.hbm %s705_s4, 256 }
 0x2d1   :  { %p564_p1 = scmp.ne.s32.totalorder %s705_s4, %s563_s30  ;;  %p567_p2 = scmp.lt.u32.totalorder %s563_s30, %s705_s4 }
 0x2d3   :  { %p569_p3 = pnand %p567_p2, %p564_p1 }
 0x2d5   :  { %572 = shalt.err (!%p569_p3)
}
 0x2d6   :  { %s587_s9 = smov 128   ;;  %s588_s10 = smov 8  }
 0x2d7   :  { %365 = dma.vmem_to_hbm [thread:$0]  %s360_s26, 256, %s705_s4, [#allocation4], %s587_s9, %s587_s9, %s588_s10  }
 0x2d8   :  { %577 = dma.done.wait [#allocation4], 256  }
 0x2d9   :  { %578 = vsyncadd [#allocation4], 4294967040 }
 0x2da   :  { %369 = vsyncpa [#allocation3], 1 }
 0x2db   :  { %370 = vsyncpa [#allocation6], 1 }
 0x2dc   :  { %371 = vsyncpa [#allocation4], 1 }

</bundles_post_ra>
